<compile_context>
chip_gen: v6e
topology: v6e:2x2x1
jax: 0.10.0
libtpu: 0.0.40
codegen_flags: <defaults>
</compile_context>

<pallas_src>
import functools

import jax
import jax.numpy as jnp
from jax.experimental import pallas as pl
from jax.experimental.pallas import tpu as pltpu


# ----------------------------------------------------------------------------
# Pallas kernel: ray normalization, per-voxel descriptor "render",
# visibility masking and F.normalize(p=2, dim=1)  (channel axis = sublanes).
# ----------------------------------------------------------------------------
def favor_desc_kernel(cam_ref, ray_ref, w_ref, desc_ref):
    # cam_ref : SMEM (3,)        f32   camera origin (rays_o, constant per call)
    # ray_ref : VMEM (4, TN)     f32   rows 0..2: un-normalized ray direction,
    #                                  row 3   : visibility mask (1.0 / 0.0)
    # w_ref   : VMEM (6, C, TN)  bf16  fused per-voxel weights [Wo_xyz; Wd_xyz]
    # desc_ref: VMEM (C, TN)     f32   L2-normalized descriptors
    r = ray_ref[...]                                               # (4, TN)

    # rays_d /= ||rays_d|| : per-lane rsqrt on the EUP.  The eps guards a
    # landmark numerically coincident with the camera center (torch -> NaN)
    # and the zero-padded lanes.
    sumsq = r[0:1] * r[0:1] + r[1:2] * r[1:2] + r[2:3] * r[2:3]    # (1, TN)
    inv_len = jax.lax.rsqrt(jnp.maximum(sumsq, 1e-24))

    # TODO(synk): the real VoxelModel (feature/density voxel-grid ray marching)
    # is not defined in the reference code; it is replaced here by a
    # deterministic per-voxel linear head  desc_i = Wo_i @ ray_o + Wd_i @ ray_d.
    # Weights load as bf16 and are upcast to f32 (no bf16 elementwise math ->
    # safe on v5e's f32-only VPU).  Scalar cam components broadcast from SMEM;
    # the (1, TN) direction rows broadcast along sublanes (cheap).
    desc = w_ref[0].astype(jnp.float32) * cam_ref[0]
    desc += w_ref[1].astype(jnp.float32) * cam_ref[1]
    desc += w_ref[2].astype(jnp.float32) * cam_ref[2]
    desc += w_ref[3].astype(jnp.float32) * (r[0:1] * inv_len)
    desc += w_ref[4].astype(jnp.float32) * (r[1:2] * inv_len)
    desc += w_ref[5].astype(jnp.float32) * (r[2:3] * inv_len)

    # Non-visible landmarks keep exactly-zero descriptors (torch leaves them 0).
    desc = desc * r[3:4]

    # F.normalize(descs, p=2, dim=1): x / max(||x||_2, 1e-12); reduce over C
    # (sublane reduce -> XLU slot), single rsqrt on the EUP.
    sq = jnp.sum(desc * desc, axis=0, keepdims=True)               # (1, TN)
    inv_norm = jax.lax.rsqrt(jnp.maximum(sq, 1e-24))
    desc_ref[...] = desc * inv_norm


def favor_descriptors(cam_t, rays, w_fused, *, tile_n=None):
    """cam_t (3,) f32; rays (4,N) f32 (dir xyz + mask); w_fused (6,C,N) bf16."""
    _, c, n = w_fused.shape

    if tile_n is None:
        # Largest lane-aligned tile covering N, capped so the double-buffered
        # working set (weights dominate: 6*C*tile*2 B) stays a small fraction
        # of VMEM even on v7x's 64 MiB parts.
        tile_n = min(128 * pl.cdiv(n, 128), 2048)
    tile_n = max(128, tile_n)
    assert tile_n % 128 == 0, "tile must be lane-dense (multiple of 128)"

    n_pad = tile_n * pl.cdiv(n, tile_n)
    if n_pad != n:
        # Only hit when N is not lane-aligned; at production scale the fused
        # weights would be stored pre-padded so this pad is a no-op.
        pad = n_pad - n
        rays = jnp.pad(rays, ((0, 0), (0, pad)))
        w_fused = jnp.pad(w_fused, ((0, 0), (0, 0), (0, pad)))

    return pl.pallas_call(
        favor_desc_kernel,
        out_shape=jax.ShapeDtypeStruct((c, n_pad), jnp.float32),
        grid=(n_pad // tile_n,),
        in_specs=[
            pl.BlockSpec(memory_space=pltpu.MemorySpace.SMEM),      # cam_t (3,)
            pl.BlockSpec((4, tile_n), lambda i: (0, i)),            # dirs+mask
            pl.BlockSpec((6, c, tile_n), lambda i: (0, 0, i)),      # weights
        ],
        out_specs=pl.BlockSpec((c, tile_n), lambda i: (0, i)),
        compiler_params=pltpu.CompilerParams(
            # Independent N-tiles -> shardable across v7x's 2 TensorCores;
            # harmless on single-TC v5e/v6e.
            dimension_semantics=("parallel",),
            # Explicit budget that is safe on v7x's 64 MiB physical VMEM.
            vmem_limit_bytes=32 * 1024 * 1024,
        ),
    )(cam_t, rays, w_fused)


# ----------------------------------------------------------------------------
# Glue (plain JAX): projection, visibility mask, visible-first packing.
# Mirrors FaVoRmodel.project_points + point_render bookkeeping.
# ----------------------------------------------------------------------------
def favor_forward(K, p_wc, pts3d, w_fused, *, h, w, tile_n=None):
    n = pts3d.shape[0]
    cam_t = p_wc[:3, 3].astype(jnp.float32)

    # project_points  (point_render passes (h, w) into the (w, h) slots, so the
    # end-to-end check is x/u against image width, y/v against image height).
    pts_h = jnp.concatenate([pts3d, jnp.ones((n, 1), pts3d.dtype)], axis=1)
    kpts_cam = jnp.linalg.inv(p_wc)[:3, :] @ pts_h.T                 # (3, N)
    mask = kpts_cam[2, :] > 0
    kps = K @ kpts_cam
    kps = (kps[:2] / kps[2]).T                                       # (N, 2)
    mask = (mask
            & (kps[:, 0] > 5) & (kps[:, 1] > 5)
            & (kps[:, 0] < w - 5) & (kps[:, 1] < h - 5))

    # Rays in the ORIGINAL landmark order, lane-dense, fused with the mask into
    # a single (4, N) slab; no gather of the big weight tensor.
    rays_d = (pts3d - cam_t[None, :]).T.astype(jnp.float32)          # (3, N)
    rays = jnp.concatenate(
        [rays_d, mask.astype(jnp.float32)[None, :]], axis=0)         # (4, N)

    desc_cn = favor_descriptors(cam_t, rays, w_fused, tile_n=tile_n)  # (C,Npad)

    # Pack visible entries first (v_ids order) to match the torch output
    # layout; the gather runs on the small (N, C) output, not the weights.
    order = jnp.argsort(jnp.logical_not(mask), stable=True)
    nv = jnp.sum(mask)
    rowmask = (jnp.arange(n) < nv)[:, None]
    descs = desc_cn[:, :n].T[order]                 # invisible rows already 0
    rendered_pts = jnp.where(rowmask, kps[order], 0.0)               # (N, 2)
    landmarks = jnp.where(rowmask, pts3d[order], 0.0)                # (N, 3)
    return descs, rendered_pts, landmarks


# ----------------------------------------------------------------------------
if __name__ == "__main__":
    key = jax.random.PRNGKey(0)
    k_xy, k_zf, k_zb, k_w = jax.random.split(key, 4)

    N_VOXELS = 512    # number of voxel models / landmarks
    CHANNELS = 32     # descriptor channels (self.channels)

    h, w = 48, 64     # non-square image to exercise the swapped bounds check
    fx = fy = 40.0
    K = jnp.array([[fx, 0.0, w / 2.0],
                   [0.0, fy, h / 2.0],
                   [0.0, 0.0, 1.0]], dtype=jnp.float32)
    # c2w / p_wc: identity rotation, small translation (camera looks down +z).
    p_wc = jnp.eye(4, dtype=jnp.float32).at[:3, 3].set(
        jnp.array([0.1, -0.1, 0.0], jnp.float32))

    # 3D landmarks: most in front of the camera, some behind (masked out).
    xy = jax.random.uniform(k_xy, (N_VOXELS, 2), minval=-0.4, maxval=0.4)
    z_front = jax.random.uniform(k_zf, (N_VOXELS - 64, 1), minval=1.0, maxval=3.0)
    z_back = jax.random.uniform(k_zb, (64, 1), minval=-2.0, maxval=-0.5)
    pts3d = jnp.concatenate(
        [xy, jnp.concatenate([z_front, z_back], axis=0)], axis=1
    ).astype(jnp.float32)

    # Deterministic synthetic per-voxel parameters (surrogate VoxelModel head),
    # fused [Wo; Wd] and stored in bf16 (halves HBM weight traffic).
    w_fused = (0.5 * jax.random.normal(k_w, (6, CHANNELS, N_VOXELS),
                                       jnp.float32)).astype(jnp.bfloat16)

    fwd = jax.jit(functools.partial(favor_forward, h=h, w=w))
    descs, rendered_pts, landmarks = fwd(K, p_wc, pts3d, w_fused)
    jax.block_until_ready((descs, rendered_pts, landmarks))

    assert descs.shape == (N_VOXELS, CHANNELS)
    assert rendered_pts.shape == (N_VOXELS, 2)
    assert landmarks.shape == (N_VOXELS, 3)
    print("KERNEL_OK")
</pallas_src>

<mosaic_0001>
module attributes {stable_mosaic.version = 11 : i64} {
  func.func @favor_desc_kernel(%arg0: i32, %arg1: memref<3xf32, #tpu.memory_space<smem>>, %arg2: memref<4x512xf32, #tpu.memory_space<vmem>>, %arg3: memref<6x32x512xbf16, #tpu.memory_space<vmem>>, %arg4: memref<32x512xf32, #tpu.memory_space<vmem>>) attributes {dimension_semantics = [#tpu.dimension_semantics<parallel>], iteration_bounds = array<i64: 1>, scalar_prefetch = 0 : i64, scratch_operands = 0 : i64, tpu.core_type = #tpu.core_type<tc>, window_params = [{transform_indices = @transform_0, window_bounds = array<i64: 3>}, {transform_indices = @transform_1, window_bounds = array<i64: 4, 512>}, {transform_indices = @transform_2, window_bounds = array<i64: 6, 32, 512>}, {transform_indices = @transform_3, window_bounds = array<i64: 32, 512>}]} {
    %c0 = arith.constant 0 : index
    %c0_0 = arith.constant 0 : index
    %0 = vector.load %arg2[%c0, %c0_0] : memref<4x512xf32, #tpu.memory_space<vmem>>, vector<4x512xf32>
    %1 = vector.extract_strided_slice %0 {offsets = [0, 0], sizes = [1, 512], strides = [1, 1]} : vector<4x512xf32> to vector<1x512xf32>
    %2 = vector.extract_strided_slice %0 {offsets = [0, 0], sizes = [1, 512], strides = [1, 1]} : vector<4x512xf32> to vector<1x512xf32>
    %3 = arith.mulf %1, %2 : vector<1x512xf32>
    %4 = vector.extract_strided_slice %0 {offsets = [1, 0], sizes = [1, 512], strides = [1, 1]} : vector<4x512xf32> to vector<1x512xf32>
    %5 = vector.extract_strided_slice %0 {offsets = [1, 0], sizes = [1, 512], strides = [1, 1]} : vector<4x512xf32> to vector<1x512xf32>
    %6 = arith.mulf %4, %5 : vector<1x512xf32>
    %7 = arith.addf %3, %6 : vector<1x512xf32>
    %8 = vector.extract_strided_slice %0 {offsets = [2, 0], sizes = [1, 512], strides = [1, 1]} : vector<4x512xf32> to vector<1x512xf32>
    %9 = vector.extract_strided_slice %0 {offsets = [2, 0], sizes = [1, 512], strides = [1, 1]} : vector<4x512xf32> to vector<1x512xf32>
    %10 = arith.mulf %8, %9 : vector<1x512xf32>
    %11 = arith.addf %7, %10 : vector<1x512xf32>
    %cst = arith.constant 1.000000e-24 : f32
    %12 = vector.broadcast %cst : f32 to vector<1x512xf32>
    %13 = arith.maximumf %11, %12 : vector<1x512xf32>
    %14 = math.rsqrt %13 : vector<1x512xf32>
    %c0_1 = arith.constant 0 : index
    %c0_2 = arith.constant 0 : index
    %c0_3 = arith.constant 0 : index
    %15 = vector.load %arg3[%c0_1, %c0_2, %c0_3] : memref<6x32x512xbf16, #tpu.memory_space<vmem>>, vector<1x32x512xbf16>
    %16 = vector.shape_cast %15 : vector<1x32x512xbf16> to vector<32x512xbf16>
    %17 = arith.extf %16 : vector<32x512xbf16> to vector<32x512xf32>
    %c0_4 = arith.constant 0 : index
    %18 = memref.load %arg1[%c0_4] : memref<3xf32, #tpu.memory_space<smem>>
    %19 = vector.broadcast %18 : f32 to vector<32x512xf32>
    %20 = arith.mulf %17, %19 : vector<32x512xf32>
    %c1 = arith.constant 1 : index
    %c0_5 = arith.constant 0 : index
    %c0_6 = arith.constant 0 : index
    %21 = vector.load %arg3[%c1, %c0_5, %c0_6] : memref<6x32x512xbf16, #tpu.memory_space<vmem>>, vector<1x32x512xbf16>
    %22 = vector.shape_cast %21 : vector<1x32x512xbf16> to vector<32x512xbf16>
    %23 = arith.extf %22 : vector<32x512xbf16> to vector<32x512xf32>
    %c1_7 = arith.constant 1 : index
    %24 = memref.load %arg1[%c1_7] : memref<3xf32, #tpu.memory_space<smem>>
    %25 = vector.broadcast %24 : f32 to vector<32x512xf32>
    %26 = arith.mulf %23, %25 : vector<32x512xf32>
    %27 = arith.addf %20, %26 : vector<32x512xf32>
    %c2 = arith.constant 2 : index
    %c0_8 = arith.constant 0 : index
    %c0_9 = arith.constant 0 : index
    %28 = vector.load %arg3[%c2, %c0_8, %c0_9] : memref<6x32x512xbf16, #tpu.memory_space<vmem>>, vector<1x32x512xbf16>
    %29 = vector.shape_cast %28 : vector<1x32x512xbf16> to vector<32x512xbf16>
    %30 = arith.extf %29 : vector<32x512xbf16> to vector<32x512xf32>
    %c2_10 = arith.constant 2 : index
    %31 = memref.load %arg1[%c2_10] : memref<3xf32, #tpu.memory_space<smem>>
    %32 = vector.broadcast %31 : f32 to vector<32x512xf32>
    %33 = arith.mulf %30, %32 : vector<32x512xf32>
    %34 = arith.addf %27, %33 : vector<32x512xf32>
    %c3 = arith.constant 3 : index
    %c0_11 = arith.constant 0 : index
    %c0_12 = arith.constant 0 : index
    %35 = vector.load %arg3[%c3, %c0_11, %c0_12] : memref<6x32x512xbf16, #tpu.memory_space<vmem>>, vector<1x32x512xbf16>
    %36 = vector.shape_cast %35 : vector<1x32x512xbf16> to vector<32x512xbf16>
    %37 = arith.extf %36 : vector<32x512xbf16> to vector<32x512xf32>
    %38 = vector.extract_strided_slice %0 {offsets = [0, 0], sizes = [1, 512], strides = [1, 1]} : vector<4x512xf32> to vector<1x512xf32>
    %39 = arith.mulf %38, %14 : vector<1x512xf32>
    %40 = vector.broadcast %39 : vector<1x512xf32> to vector<32x512xf32>
    %41 = arith.mulf %37, %40 : vector<32x512xf32>
    %42 = arith.addf %34, %41 : vector<32x512xf32>
    %c4 = arith.constant 4 : index
    %c0_13 = arith.constant 0 : index
    %c0_14 = arith.constant 0 : index
    %43 = vector.load %arg3[%c4, %c0_13, %c0_14] : memref<6x32x512xbf16, #tpu.memory_space<vmem>>, vector<1x32x512xbf16>
    %44 = vector.shape_cast %43 : vector<1x32x512xbf16> to vector<32x512xbf16>
    %45 = arith.extf %44 : vector<32x512xbf16> to vector<32x512xf32>
    %46 = vector.extract_strided_slice %0 {offsets = [1, 0], sizes = [1, 512], strides = [1, 1]} : vector<4x512xf32> to vector<1x512xf32>
    %47 = arith.mulf %46, %14 : vector<1x512xf32>
    %48 = vector.broadcast %47 : vector<1x512xf32> to vector<32x512xf32>
    %49 = arith.mulf %45, %48 : vector<32x512xf32>
    %50 = arith.addf %42, %49 : vector<32x512xf32>
    %c5 = arith.constant 5 : index
    %c0_15 = arith.constant 0 : index
    %c0_16 = arith.constant 0 : index
    %51 = vector.load %arg3[%c5, %c0_15, %c0_16] : memref<6x32x512xbf16, #tpu.memory_space<vmem>>, vector<1x32x512xbf16>
    %52 = vector.shape_cast %51 : vector<1x32x512xbf16> to vector<32x512xbf16>
    %53 = arith.extf %52 : vector<32x512xbf16> to vector<32x512xf32>
    %54 = vector.extract_strided_slice %0 {offsets = [2, 0], sizes = [1, 512], strides = [1, 1]} : vector<4x512xf32> to vector<1x512xf32>
    %55 = arith.mulf %54, %14 : vector<1x512xf32>
    %56 = vector.broadcast %55 : vector<1x512xf32> to vector<32x512xf32>
    %57 = arith.mulf %53, %56 : vector<32x512xf32>
    %58 = arith.addf %50, %57 : vector<32x512xf32>
    %59 = vector.extract_strided_slice %0 {offsets = [3, 0], sizes = [1, 512], strides = [1, 1]} : vector<4x512xf32> to vector<1x512xf32>
    %60 = vector.broadcast %59 : vector<1x512xf32> to vector<32x512xf32>
    %61 = arith.mulf %58, %60 : vector<32x512xf32>
    %62 = arith.mulf %61, %61 : vector<32x512xf32>
    %cst_17 = arith.constant dense<0.000000e+00> : vector<512xf32>
    %63 = vector.multi_reduction <add>, %62, %cst_17 [0] : vector<32x512xf32> to vector<512xf32>
    %64 = vector.shape_cast %63 : vector<512xf32> to vector<1x512xf32>
    %cst_18 = arith.constant 1.000000e-24 : f32
    %65 = vector.broadcast %cst_18 : f32 to vector<1x512xf32>
    %66 = arith.maximumf %64, %65 : vector<1x512xf32>
    %67 = math.rsqrt %66 : vector<1x512xf32>
    %68 = vector.broadcast %67 : vector<1x512xf32> to vector<32x512xf32>
    %69 = arith.mulf %61, %68 : vector<32x512xf32>
    %c0_19 = arith.constant 0 : index
    %c0_20 = arith.constant 0 : index
    %70 = vector.load %arg4[%c0_19, %c0_20] : memref<32x512xf32, #tpu.memory_space<vmem>>, vector<32x512xf32>
    tpu.vector_store %arg4[%c0_19, %c0_20], %69 {strides = array<i32>} : memref<32x512xf32, #tpu.memory_space<vmem>>, vector<32x512xf32>,
    return
  }
  func.func @transform_0(%arg0: i32) -> i32 {
    %c0_i32 = arith.constant 0 : i32
    %c0_i32_0 = arith.constant 0 : i32
    return %c0_i32 : i32
  }
  func.func @transform_1(%arg0: i32) -> (i32, i32) {
    %c0_i32 = arith.constant 0 : i32
    %c0_i32_0 = arith.constant 0 : i32
    return %c0_i32, %arg0 : i32, i32
  }
  func.func @transform_2(%arg0: i32) -> (i32, i32, i32) {
    %c0_i32 = arith.constant 0 : i32
    %c0_i32_0 = arith.constant 0 : i32
    %c0_i32_1 = arith.constant 0 : i32
    return %c0_i32, %c0_i32_0, %arg0 : i32, i32, i32
  }
  func.func @transform_3(%arg0: i32) -> (i32, i32) {
    %c0_i32 = arith.constant 0 : i32
    %c0_i32_0 = arith.constant 0 : i32
    return %c0_i32, %arg0 : i32, i32
  }
}

</mosaic_0001>

<bundles_post_ra>
// kernel: custom-call.13
= control target key start
LH: loop header
LB: loop body
LE: loop exit
PB: predicated region body
PF: predicated region fallthrough
CT: control target
= control target key end

     0   :  { %v40_v1 = vlaneseq  ;;  %v155_v11 = vmov -1.0   ;;  %s172_s0 = inlined_call_operand.vmem [shape: f32[1,4,4], index: 0, kind: input, shape index: {}]   ;;  %s173_s1 = inlined_call_operand.vmem [shape: f32[1,4,4], index: 1, kind: output, shape index: {}]  }
   0x1   :  { %v18_v0 = vld [vmem:[%s172_s0] sm:$0xf] }
   0x2   :  { %19 = vst [vmem:[#allocation1] sm:$0xf] %v18_v0  ;;  %v41_v3 = vand.u32 127, %v40_v1  ;;  %v44_v4 = vshrl.u32 %v40_v1, 7 }
   0x4   :  { %vm42_vm0 = vcmp.lt.s32.totalorder %v41_v3, 4  ;;  %vm51_vm1 = vcmp.ge.s32.totalorder %v44_v4, %v41_v3  ;;  %vm46_vm2 = vcmp.eq.s32.totalorder %v44_v4, %v41_v3  ;;  %vm65_vm4 = vcmp.eq.s32.totalorder %v41_v3, 0 }
   0x5   :  { %vm52_vm3 = vmand %vm51_vm1, %vm42_vm0  ;;  %vm62_vm5 = vcmp.eq.s32.totalorder %v41_v3, %v44_v4  ;;  %v66_v12 = vsel %vm65_vm4, 1.0, %v155_v11  ;;  %vm73_vm6 = vcmp.eq.s32.totalorder %v41_v3, 1  ;;  %vm83_vm7 = vcmp.eq.s32.totalorder %v41_v3, 2 }
   0x6   :  { %v67_v13 = vsel %vm62_vm5, %v66_v12, 0.0  ;;  %vm93_vm8 = vcmp.eq.s32.totalorder %v41_v3, 3 }
   0x9   :  { %v38_v2 = vld [vmem:[#allocation1] sm:$0xf] }
   0xa   :  { %39 = vst [vmem:[#allocation0] sm:$0xf] %v38_v2 }
  0x11   :  { %v47_v5 = vld [vmem:[#allocation0] sm:$0xff] }
  0x12   :  { %v48_v6 = vsel %vm46_vm2, %v47_v5, 0.0  ;;  %v53_v7 = vsel %vm52_vm3, %v47_v5, 0.0 }
  0x13   :  { %49 = vadd.xlane.f32.xlu0 %v48_v6 }
  0x9c   :  { %v50_v8 = vpop.xlane.xlu0 %49 }
  0x9d   :  { %153 = vrcp.f32 %v50_v8  ;;  %vm100_vm9 = vweird.f32 %v50_v8 }
  0xaa   :  { %v154_v9 = vpop.eup %153 }
  0xab   :  { %v55_v10 = vmul.f32 %v154_v9, %v53_v7 }
  0xad   :  { %56 = vst [vmem:[#allocation4] sm:$0xff] %v55_v10 }
  0xb4   :  { %v69_v14 = vld [vmem:[#allocation4 + $0x1] ss:$0 sm:$0xff]  ;;  %v79_v17 = vld [vmem:[#allocation4 + $0x2] ss:$0 sm:$0xff]  ;;  %v89_v22 = vld [vmem:[#allocation4 + $0x3] ss:$0 sm:$0xff] }
  0xb5   :  { %v70_v15 = vxor.u32 2147483648, %v69_v14  ;;  %v80_v19 = vxor.u32 2147483648, %v79_v17  ;;  %v90_v24 = vxor.u32 2147483648, %v89_v22 }
  0xb7   :  { %v74_v16 = vmul.f32 %v70_v15, %v67_v13 }
  0xb9   :  { %75 = vadd.xlane.f32.xlu0 %v74_v16 }
 0x142   :  { %v76_v18 = vpop.xlane.xlu0 %75 }
 0x143   :  { %v77_v20 = vsel %vm73_vm6, %v76_v18, %v67_v13 }
 0x144   :  { %v84_v21 = vmul.f32 %v80_v19, %v77_v20 }
 0x146   :  { %85 = vadd.xlane.f32.xlu1 %v84_v21 }
 0x1cf   :  { %v86_v23 = vpop.xlane.xlu1 %85 }
 0x1d0   :  { %v87_v25 = vsel %vm83_vm7, %v86_v23, %v77_v20 }
 0x1d1   :  { %v94_v26 = vmul.f32 %v90_v24, %v87_v25 }
 0x1d3   :  { %95 = vadd.xlane.f32.xlu1 %v94_v26 }
 0x25c   :  { %v96_v27 = vpop.xlane.xlu1 %95 }
 0x25d   :  { %v97_v28 = vsel %vm93_vm8, %v96_v27, %v87_v25 }
 0x25e   :  { %v99_v29 = vmul.f32 %v154_v9, %v97_v28 }
 0x260   :  { %v101_v30 = vsel %vm100_vm9, %v97_v28, %v99_v29 }
 0x261   :  { %102 = vst [vmem:[#allocation2] sm:$0xff] %v101_v30 }
 0x268   :  { %v107_v31 = vld [vmem:[#allocation2] sm:$0xf] }
 0x269   :  { %110 = vst [vmem:[#allocation3] sm:$0xf] %v107_v31 }
 0x270   :  { %v127_v32 = vld [vmem:[#allocation3] sm:$0xf] }
 0x271   :  { %128 = vst [vmem:[%s173_s1] sm:$0xf] %v127_v32 }

// kernel: custom-call.11
= control target key start
LH: loop header
LB: loop body
LE: loop exit
PB: predicated region body
PF: predicated region fallthrough
CT: control target
= control target key end

     0   :  { %5 = vsyncpa [#allocation6], 0  ;;  %v77_v1 = vlaneseq  ;;  %v534_v2 = vmov 0   ;;  %s563_s14 = smov 0   ;;  %s604_s0 = inlined_call_operand.vmem [shape: f32[4,4], index: 0, kind: input, shape index: {}]   ;;  %s605_s1 = inlined_call_operand.vmem [shape: f32[4,4], index: 1, kind: output, shape index: {0}]   ;;  %s606_s2 = inlined_call_operand.hbm [shape: s32[4], index: 2, kind: output, shape index: {1}]   ;;  %s607_s3 = inlined_call_operand.vmem [shape: s32[4], index: 3, kind: output, shape index: {2}]  }
   0x1   :  { %v67_v0 = vld [vmem:[%s604_s0] sm:$0xf]  ;;  %76 = vst [vmem:[#allocation4] sm:$0x1] %v534_v2 }
   0x2   :  { %68 = vst [vmem:[#allocation1] sm:$0xf] %v67_v0  ;;  %v560_v3 = vshrl.u32 %v77_v1, 7 }
   0x4   :  { %81 = vst [vmem:[#allocation9] sm:$0xff] %v560_v3 }
   0x9   :  { %v72_v4 = vld [vmem:[#allocation1] sm:$0xf] }
   0xa   :  { %73 = vst [vmem:[#allocation0] sm:$0xf] %v72_v4 }
  0x11   :  { %v74_v5 = vld [vmem:[#allocation0] sm:$0xff] }
  0x12   :  { %75 = vst [vmem:[#allocation2] sm:$0xff] %v74_v5 }
  0x13 LB: > { %vm97_vm0 = vcmp.lt.s32.totalorder %v560_v3, 4  ;;  %v570_v8 = vstv %s532_s14  ;;  %s138_s0 = ssub.s32 128, %s532_s14  ;;  %v144_v38 = vand.u32 127, %v77_v1  ;;  %v147_v40 = vld [vmem:[#allocation4] ss:$0 sm:$0xff]  ;;  %s150_s15 = scalar_lea.vmem [#allocation2], %s532_s14  ;;  %s532_s14 = sphi %s563_s14, %s87_s14  }
  0x14   : > { %vm96_vm1 = vcmp.ge.s32.totalorder %v560_v3, %v570_v8  ;;  %s156_s17 = scalar_lea.vmem [#allocation9], %s532_s14  ;;  %vm176_vm15 = vcmp.gt.s32.totalorder %v560_v3, %v570_v8  ;;  %s87_s14 = sadd.s32 1, %s532_s14  }
  0x15   : > { %vm98_vm3 = vmand %vm96_vm1, %vm97_vm0  ;;  %vm168_vm12 = vcmp.gt.s32.totalorder %v144_v38, %v570_v8  ;;  %vm145_vm13 = vcmp.eq.s32.totalorder %v144_v38, %v570_v8  ;;  %v158_v42 = vld [vmem:[%s156_s17] ss:$0 sm:$0xff]  ;;  %p84_p0 = scmp.ge.s32.totalorder %s87_s14, 4  }
  0x16   : > { %vm180_vm1 = vmand %vm176_vm15, %vm145_vm13  ;;  %s535_s20 = smov (%p84_p0), [#allocation5]  }
  0x17   :  { %s328_s21 = sshll.u32 (%p84_p0), %s535_s20, 4  ;;  %s329_s21 = int_to_ptr.vmem [resolvable:$true] %s328_s21 }
  0x18   :  { %s504_s24 = scalar_lea.vmem (%p84_p0), %s329_s21, 16  ;;  %s508_s25 = scalar_lea.vmem (%p84_p0), %s329_s21, 32 }
  0x19   : > { %v92_v6 = vld [vmem:[#allocation2] sm:$0xff]  ;;  %v152_v41 = vld [vmem:[%s150_s15] ss:$0 sm:$0xff]  ;;  %p505_p1 = scmp.ne.s32.totalorder (%p84_p0), %s329_s21, %s504_s24  ;;  %p509_p2 = scmp.lt.s32.totalorder (%p84_p0), %s329_s21, %s329_s21 }
  0x1a   : > { %v93_v7 = vand.u32 2147483647, %v92_v6  ;;  %p510_p3 = scmp.lt.s32.totalorder (%p84_p0), %s508_s25, %s504_s24 }
  0x1c   : > { %vm483_vm2 = vcmp.gt.f32.partialorder %v93_v7, -inf  ;;  %p511_p4 = por (%p84_p0), %p510_p3, %p509_p2 }
  0x1d   : > { %vm100_vm4 = vmand %vm98_vm3, %vm483_vm2 }
  0x1e   : > { %v101_v9 = vsel %vm100_vm4, %v560_v3, %v570_v8  ;;  %v102_v10 = vsel %vm100_vm4, %v93_v7, -inf  ;;  %p512_p5 = pnand (%p84_p0), %p511_p4, %p505_p1 }
  0x1f   : > { %v103_v11 = vrot.slane %v102_v10, 1  ;;  %v104_v12 = vrot.slane %v101_v9, 1 }
  0x21   : > { %vm105_vm5 = vcmp.ge.f32.partialorder %v103_v11, %v102_v10  ;;  %v108_v13 = vrot.slane %v103_v11, 1  ;;  %v109_v14 = vrot.slane %v104_v12, 1 }
  0x22   : > { %v106_v15 = vsel %vm105_vm5, %v103_v11, %v102_v10  ;;  %v107_v16 = vsel %vm105_vm5, %v104_v12, %v101_v9 }
  0x23   : > { %vm110_vm6 = vcmp.ge.f32.partialorder %v108_v13, %v106_v15  ;;  %v113_v17 = vrot.slane %v108_v13, 1  ;;  %v114_v18 = vrot.slane %v109_v14, 1 }
  0x24   : > { %v111_v19 = vsel %vm110_vm6, %v108_v13, %v106_v15  ;;  %v112_v20 = vsel %vm110_vm6, %v109_v14, %v107_v16 }
  0x25   : > { %vm115_vm7 = vcmp.ge.f32.partialorder %v113_v17, %v111_v19  ;;  %v118_v21 = vrot.slane %v113_v17, 1  ;;  %v119_v22 = vrot.slane %v114_v18, 1 }
  0x26   : > { %v116_v23 = vsel %vm115_vm7, %v113_v17, %v111_v19  ;;  %v117_v24 = vsel %vm115_vm7, %v114_v18, %v112_v20 }
  0x27   : > { %vm120_vm8 = vcmp.ge.f32.partialorder %v118_v21, %v116_v23  ;;  %v123_v25 = vrot.slane %v118_v21, 1  ;;  %v124_v26 = vrot.slane %v119_v22, 1 }
  0x28   : > { %v121_v27 = vsel %vm120_vm8, %v118_v21, %v116_v23  ;;  %v122_v28 = vsel %vm120_vm8, %v119_v22, %v117_v24 }
  0x29   : > { %vm125_vm9 = vcmp.ge.f32.partialorder %v123_v25, %v121_v27  ;;  %v128_v29 = vrot.slane %v123_v25, 1  ;;  %v129_v30 = vrot.slane %v124_v26, 1 }
  0x2a   : > { %v126_v31 = vsel %vm125_vm9, %v123_v25, %v121_v27  ;;  %v127_v32 = vsel %vm125_vm9, %v124_v26, %v122_v28 }
  0x2b   : > { %vm130_vm10 = vcmp.ge.f32.partialorder %v128_v29, %v126_v31  ;;  %v133_v33 = vrot.slane %v128_v29, 1  ;;  %v134_v34 = vrot.slane %v129_v30, 1 }
  0x2c   : > { %v131_v35 = vsel %vm130_vm10, %v128_v29, %v126_v31  ;;  %v132_v36 = vsel %vm130_vm10, %v129_v30, %v127_v32 }
  0x2d   : > { %vm135_vm11 = vcmp.ge.f32.partialorder %v133_v33, %v131_v35 }
  0x2e   : > { %v137_v37 = vsel %vm135_vm11, %v134_v34, %v132_v36 }
  0x2f   : > { %139 = vrot.lane.b32.xlu0 %v137_v37, %s138_s0 }
  0xa1   : > { %v140_v39 = vpop.permute.xlu0 %139 }
  0xa2   : > { %490 = vpush %v140_v39 }
  0xd3   : > { %s491_s16 = spop %490 }
  0xd4   : > { %v146_v43 = vstv %s491_s16  ;;  %s151_s18 = scalar_lea.vmem [#allocation2], %s491_s16  ;;  %s157_s19 = scalar_lea.vmem [#allocation9], %s491_s16 }
  0xd5   : > { %v153_v44 = vld [vmem:[%s151_s18] ss:$0 sm:$0xff]  ;;  %v148_v46 = vsel %vm145_vm13, %v146_v43, %v147_v40 }
  0xd6   : > { %v159_v45 = vld [vmem:[%s157_s19] ss:$0 sm:$0xff]  ;;  %154 = vst [vmem:[%s151_s18] sm:$0x1] %v152_v41  ;;  %vm162_vm14 = vcmp.ne.f32.partialorder %v153_v44, 0.0  ;;  %149 = vst [vmem:[#allocation4] sm:$0x1] %v148_v46 }
  0xd7   : > { %160 = vst [vmem:[%s157_s19] sm:$0x1] %v158_v42  ;;  %155 = vst [vmem:[%s150_s15] sm:$0x1] %v153_v44  ;;  %v169_v53 = vsel %vm168_vm12, %v153_v44, 0.0 }
  0xd8   : > { %161 = vst [vmem:[%s156_s17] sm:$0x1] %v159_v45  ;;  %vm163_vm0 = vmand %vm145_vm13, %vm162_vm14 }
  0xd9   : > { %v164_v47 = vsel %vm163_vm0, %v153_v44, 1.0 }
  0xda   : > { %v177_v48 = vsel %vm176_vm15, %v164_v47, 1.0 }
  0xdb   : > { %502 = vrcp.f32 %v177_v48 }
  0xdd   :  { %v248_v59 = vld [vmem:[#allocation4] sm:$0x1] (%p84_p0) }
  0xde   : > { %v173_v50 = vld [vmem:[#allocation2] sm:$0xff]  ;;  %251 = vst [vmem:[#allocation5] sm:$0x1] (%p84_p0), %v248_v59 }
  0xdf   :  { %v187_v57 = vld [vmem:[#allocation9] sm:$0xff] (%p84_p0) }
  0xe8   : > { %v503_v49 = vpop.eup %502 }
  0xe9   : > { %v179_v51 = vmul.f32 %v503_v49, %v173_v50 }
  0xeb   : > { %v181_v52 = vsel %vm180_vm1, %v179_v51, 0.0 }
  0xec   : > { %182 = vadd.xlane.f32.xlu0 %v181_v52 }
 0x119   :  { %203 = vxpose.xlu0.b32.start.end [1/1] (short) (narrow) (%p84_p0), %v187_v57, 8 }
 0x175   : > { %v183_v54 = vpop.xlane.xlu0 %182 }
 0x176   : > { %v184_v55 = vmul.f32 %v183_v54, %v169_v53  ;;  %86 = sbr.rel (!%p84_p0) target bundleno = 19 (0x13), region = 163 }
 0x178   : > { %v185_v56 = vsub.f32 %v179_v51, %v184_v55 }
 0x17a   : > { %186 = vst [vmem:[#allocation2] sm:$0xff] %v185_v56 }
 0x181   :  { %v240_v58 = vld [vmem:[#allocation2] sm:$0xf] }
 0x182   :  { %243 = vst [vmem:[#allocation3] sm:$0xf] %v240_v58 }
 0x189   :  { %v321_v60 = vld [vmem:[#allocation3] sm:$0xf] }
 0x18a   :  { %322 = vst [vmem:[%s605_s1] sm:$0xf] %v321_v60 }
 0x18b   :  { %515 = shalt.err (!%p512_p5)
}
 0x18c   :  { %331 = dma.vmem_to_hbm [thread:$0]  %s329_s21, 16, %s606_s2, [#allocation6]  }
 0x195   :  { %v219_v61 = vpop.trf.xlu0 }
 0x196   :  { %235 = vst [vmem:[#allocation7] sm:$0x1] %v219_v61 }
 0x19d   :  { %v256_v62 = vld [vmem:[#allocation7] sm:$0x1] }
 0x19e   :  { %259 = vst [vmem:[#allocation8] sm:$0x1] %v256_v62 }
 0x1a5   :  { %v395_v63 = vld [vmem:[#allocation8] sm:$0x1] }
 0x1a6   :  { %396 = vst [vmem:[%s607_s3] sm:$0x1] %v395_v63 }
 0x1a7   :  { %528 = dma.done.wait [#allocation6], 16  }
 0x1a8   :  { %529 = vsyncadd [#allocation6], 4294967280 }
 0x1a9   :  { %402 = vsyncpa [#allocation6], 1 }

// kernel: custom-call.12
= control target key start
LH: loop header
LB: loop body
LE: loop exit
PB: predicated region body
PF: predicated region fallthrough
CT: control target
= control target key end

     0   :  { %v40_v1 = vlaneseq  ;;  %v154_v11 = vmov -1.0   ;;  %s171_s0 = inlined_call_operand.vmem [shape: f32[1,4,4], index: 0, kind: input, shape index: {}]   ;;  %s172_s1 = inlined_call_operand.vmem [shape: f32[1,4,4], index: 1, kind: output, shape index: {}]  }
   0x1   :  { %v18_v0 = vld [vmem:[%s171_s0] sm:$0xf] }
   0x2   :  { %19 = vst [vmem:[#allocation1] sm:$0xf] %v18_v0  ;;  %v41_v3 = vand.u32 127, %v40_v1  ;;  %v44_v4 = vshrl.u32 %v40_v1, 7 }
   0x4   :  { %vm42_vm0 = vcmp.lt.s32.totalorder %v41_v3, 4  ;;  %vm51_vm1 = vcmp.le.s32.totalorder %v44_v4, %v41_v3  ;;  %vm46_vm2 = vcmp.eq.s32.totalorder %v44_v4, %v41_v3  ;;  %vm65_vm4 = vcmp.eq.s32.totalorder %v41_v3, 3 }
   0x5   :  { %vm52_vm3 = vmand %vm51_vm1, %vm42_vm0  ;;  %vm62_vm5 = vcmp.eq.s32.totalorder %v41_v3, %v44_v4  ;;  %v66_v12 = vsel %vm65_vm4, 1.0, %v154_v11  ;;  %vm73_vm6 = vcmp.eq.s32.totalorder %v41_v3, 2  ;;  %vm83_vm7 = vcmp.eq.s32.totalorder %v41_v3, 1 }
   0x6   :  { %v67_v13 = vsel %vm62_vm5, %v66_v12, 0.0  ;;  %vm92_vm8 = vcmp.eq.s32.totalorder %v41_v3, 0 }
   0x9   :  { %v38_v2 = vld [vmem:[#allocation1] sm:$0xf] }
   0xa   :  { %39 = vst [vmem:[#allocation0] sm:$0xf] %v38_v2 }
  0x11   :  { %v47_v5 = vld [vmem:[#allocation0] sm:$0xff] }
  0x12   :  { %v48_v6 = vsel %vm46_vm2, %v47_v5, 0.0  ;;  %v53_v7 = vsel %vm52_vm3, %v47_v5, 0.0 }
  0x13   :  { %49 = vadd.xlane.f32.xlu0 %v48_v6 }
  0x9c   :  { %v50_v8 = vpop.xlane.xlu0 %49 }
  0x9d   :  { %152 = vrcp.f32 %v50_v8  ;;  %vm99_vm9 = vweird.f32 %v50_v8 }
  0xaa   :  { %v153_v9 = vpop.eup %152 }
  0xab   :  { %v55_v10 = vmul.f32 %v153_v9, %v53_v7 }
  0xad   :  { %56 = vst [vmem:[#allocation4] sm:$0xff] %v55_v10 }
  0xb4   :  { %v69_v14 = vld [vmem:[#allocation4 + $0x2] ss:$0 sm:$0xff]  ;;  %v79_v17 = vld [vmem:[#allocation4 + $0x1] ss:$0 sm:$0xff]  ;;  %v88_v22 = vld [vmem:[#allocation4] ss:$0 sm:$0xff] }
  0xb5   :  { %v70_v15 = vxor.u32 2147483648, %v69_v14  ;;  %v80_v19 = vxor.u32 2147483648, %v79_v17  ;;  %v89_v24 = vxor.u32 2147483648, %v88_v22 }
  0xb7   :  { %v74_v16 = vmul.f32 %v70_v15, %v67_v13 }
  0xb9   :  { %75 = vadd.xlane.f32.xlu0 %v74_v16 }
 0x142   :  { %v76_v18 = vpop.xlane.xlu0 %75 }
 0x143   :  { %v77_v20 = vsel %vm73_vm6, %v76_v18, %v67_v13 }
 0x144   :  { %v84_v21 = vmul.f32 %v80_v19, %v77_v20 }
 0x146   :  { %85 = vadd.xlane.f32.xlu1 %v84_v21 }
 0x1cf   :  { %v86_v23 = vpop.xlane.xlu1 %85 }
 0x1d0   :  { %v87_v25 = vsel %vm83_vm7, %v86_v23, %v77_v20 }
 0x1d1   :  { %v93_v26 = vmul.f32 %v89_v24, %v87_v25 }
 0x1d3   :  { %94 = vadd.xlane.f32.xlu1 %v93_v26 }
 0x25c   :  { %v95_v27 = vpop.xlane.xlu1 %94 }
 0x25d   :  { %v96_v28 = vsel %vm92_vm8, %v95_v27, %v87_v25 }
 0x25e   :  { %v98_v29 = vmul.f32 %v153_v9, %v96_v28 }
 0x260   :  { %v100_v30 = vsel %vm99_vm9, %v96_v28, %v98_v29 }
 0x261   :  { %101 = vst [vmem:[#allocation2] sm:$0xff] %v100_v30 }
 0x268   :  { %v106_v31 = vld [vmem:[#allocation2] sm:$0xf] }
 0x269   :  { %109 = vst [vmem:[#allocation3] sm:$0xf] %v106_v31 }
 0x270   :  { %v126_v32 = vld [vmem:[#allocation3] sm:$0xf] }
 0x271   :  { %127 = vst [vmem:[%s172_s1] sm:$0xf] %v126_v32 }

// kernel: favor_forward.1
= control target key start
LH: loop header
LB: loop body
LE: loop exit
PB: predicated region body
PF: predicated region fallthrough
CT: control target
= control target key end

     0   :  { %8 = vsyncpa [#allocation3], 0  ;;  %s1459_s0 = inlined_call_operand.vmem [shape: f32[3], index: 0, kind: input, shape index: {}]   ;;  %s1460_s1 = inlined_call_operand.vmem [shape: f32[4,512], index: 1, kind: input, shape index: {}]   ;;  %s1461_s2 = inlined_call_operand.vmem [shape: bf16[6,32,512], index: 2, kind: input, shape index: {}]   ;;  %s1462_s3 = inlined_call_operand.vmem [shape: f32[32,512], index: 3, kind: output, shape index: {}]  }
   0x1   :  { %s15_s14 = sshll.u32 %s1459_s0, 4  ;;  %s16_s14 = int_to_ptr.vmem [resolvable:$true] %s15_s14 }
   0x2   :  { %s724_s15 = scalar_lea.vmem %s16_s14, 16  ;;  %p729_p1 = scmp.lt.s32.totalorder %s16_s14, %s16_s14 }
   0x3   :  { %p725_p0 = scmp.ne.s32.totalorder %s16_s14, %s724_s15  ;;  %p730_p2 = scmp.lt.s32.totalorder %s724_s15, %s724_s15 }
   0x5   :  { %p731_p3 = por %p730_p2, %p729_p1 }
   0x7   :  { %p732_p4 = pnand %p731_p3, %p725_p0 }
   0x9   :  { %735 = shalt.err (!%p732_p4)
}
   0xa   :  { %s738_s16 = smov [#allocation2]  }
   0xb   :  { %18 = dma.vmem_to_smem %s16_s14, 16, %s738_s16, [#allocation3]  }
   0xc   :  { %736 = dma.done.wait [#allocation3], 16  }
   0xd   :  { %737 = vsyncadd [#allocation3], 4294967280 }
   0xe   :  { %26 = sfence }
   0xf   :  { %v765_v0 = vld [vmem:[%s1460_s1] sm:$0xff]  ;;  %v775_v2 = vld [vmem:[%s1461_s2 + $0x10] sm:$0xff]  ;;  %s777_s22 = sld [smem:[#allocation2]]  ;;  %v242_v3 = vlaneseq }
  0x10   :  { %v770_v1 = vld [vmem:[%s1461_s2] sm:$0xff]  ;;  %v29_v4 = vmul.f32 %v765_v0, %v765_v0  ;;  %v789_v6 = vld [vmem:[%s1461_s2 + $0x30] sm:$0xff]  ;;  %v65_v8 = vunpack.c.l.bf16 %v775_v2  ;;  %s798_s29 = sld [smem:[#allocation2 + $0x1]] }
  0x11   :  { %v784_v5 = vld [vmem:[%s1461_s2 + $0x20] sm:$0xff]  ;;  %v61_v7 = vunpack.c.l.bf16 %v770_v1  ;;  %v62_v10 = vunpack.c.h.bf16 %v770_v1  ;;  %v73_v12 = vunpack.c.l.bf16 %v789_v6  ;;  %v806_v13 = vld [vmem:[%s1461_s2 + $0x50] sm:$0xff]  ;;  %s819_s9 = sld [smem:[#allocation2 + $0x2]]  ;;  %v821_v17 = vshrl.u32 %v242_v3, 7 }
  0x12   :  { %v796_v9 = vld [vmem:[%s1461_s2 + $0x40] sm:$0xff]  ;;  %v69_v11 = vunpack.c.l.bf16 %v784_v5  ;;  %v816_v15 = vld [vmem:[%s1461_s2 + $0x70] sm:$0xff]  ;;  %v665_v18 = vrot.slane %v29_v4, 9  ;;  %v667_v19 = vrot.slane %v29_v4, 10  ;;  %v108_v20 = vunpack.c.l.bf16 %v806_v13 }
  0x13   :  { %v811_v14 = vld [vmem:[%s1461_s2 + $0x60] sm:$0xff]  ;;  %v104_v16 = vunpack.c.l.bf16 %v796_v9  ;;  %v833_v23 = vld [vmem:[%s1461_s2 + $0x90] sm:$0xff]  ;;  %v116_v25 = vunpack.c.l.bf16 %v816_v15  ;;  %v883_v42 = vsub.s32 0, %v821_v17 }
  0x14   :  { %v112_v21 = vunpack.c.l.bf16 %v811_v14  ;;  %v828_v22 = vld [vmem:[%s1461_s2 + $0x80] sm:$0xff]  ;;  %v844_v26 = vld [vmem:[%s1461_s2 + $0xb0] sm:$0xff]  ;;  %v167_v28 = vunpack.c.l.bf16 %v833_v23  ;;  %v39_v32 = vadd.f32 %v665_v18, %v29_v4 }
  0x15   :  { %v838_v24 = vld [vmem:[%s1461_s2 + $0xa0] sm:$0xff]  ;;  %v163_v27 = vunpack.c.l.bf16 %v828_v22  ;;  %v857_v31 = vld [vmem:[%s1461_s2 + $0xd0] sm:$0xff]  ;;  %v175_v33 = vunpack.c.l.bf16 %v844_v26  ;;  %v878_v39 = vstv %s777_s22 }
  0x16   :  { %v171_v29 = vunpack.c.l.bf16 %v838_v24  ;;  %v852_v30 = vld [vmem:[%s1461_s2 + $0xc0] sm:$0xff]  ;;  %v868_v35 = vld [vmem:[%s1461_s2 + $0xf0] sm:$0xff]  ;;  %v226_v37 = vunpack.c.l.bf16 %v857_v31  ;;  %v47_v43 = vadd.f32 %v667_v19, %v39_v32  ;;  %v79_v44 = vmul.f32 %v878_v39, %v61_v7 }
  0x17   :  { %v863_v34 = vld [vmem:[%s1461_s2 + $0xe0] sm:$0xff]  ;;  %v222_v36 = vunpack.c.l.bf16 %v852_v30  ;;  %v234_v41 = vunpack.c.l.bf16 %v868_v35  ;;  %v83_v45 = vmul.f32 %v878_v39, %v65_v8  ;;  %v87_v46 = vmul.f32 %v878_v39, %v69_v11  ;;  %v902_v55 = vld [vmem:[%s1461_s2 + $0x110] sm:$0xff] }
  0x18   :  { %v875_v38 = vld [vmem:[%s1461_s2 + $0x100] sm:$0xff]  ;;  %v230_v40 = vunpack.c.l.bf16 %v863_v34  ;;  %v91_v47 = vmul.f32 %v878_v39, %v73_v12  ;;  %v890_v48 = vstv %s798_s29  ;;  %v893_v49 = vstv %s819_s9  ;;  %v916_v61 = vld [vmem:[%s1461_s2 + $0x130] sm:$0xff] }
  0x19   :  { %v319_v50 = vunpack.c.l.bf16 %v875_v38  ;;  %v49_v51 = vmax.f32 %v47_v43, 1e-24  ;;  %v122_v52 = vmul.f32 %v890_v48, %v104_v16  ;;  %v126_v53 = vmul.f32 %v890_v48, %v108_v20  ;;  %v907_v56 = vld [vmem:[%s1461_s2 + $0x120] sm:$0xff]  ;;  %v926_v7 = vld [vmem:[%s1461_s2 + $0x150] sm:$0xff] }
  0x1a   :  { %v130_v54 = vmul.f32 %v890_v48, %v112_v21  ;;  %v134_v57 = vmul.f32 %v890_v48, %v116_v25  ;;  %v181_v58 = vmul.f32 %v893_v49, %v163_v27  ;;  %v185_v59 = vmul.f32 %v893_v49, %v167_v28  ;;  %v921_v4 = vld [vmem:[%s1461_s2 + $0x140] sm:$0xff]  ;;  %v939_v19 = vld [vmem:[%s1461_s2 + $0x170] sm:$0xff] }
  0x1b   :  { %v189_v60 = vmul.f32 %v893_v49, %v171_v29  ;;  %712 = vrsqrt.f32 %v49_v51  ;;  %v138_v62 = vadd.f32 %v122_v52, %v79_v44  ;;  %v142_v63 = vadd.f32 %v126_v53, %v83_v45  ;;  %v934_v18 = vld [vmem:[%s1461_s2 + $0x160] sm:$0xff] }
  0x1c   :  { %v146_v3 = vadd.f32 %v130_v54, %v87_v46  ;;  %v150_v8 = vadd.f32 %v134_v57, %v91_v47  ;;  %v193_v11 = vmul.f32 %v893_v49, %v175_v33  ;;  %v323_v12 = vunpack.c.l.bf16 %v902_v55 }
  0x1d   :  { %v327_v16 = vunpack.c.l.bf16 %v907_v56  ;;  %v941_v20 = vadd.f32 %v181_v58, %v138_v62  ;;  %v943_v21 = vadd.f32 %v185_v59, %v142_v63  ;;  %v331_v27 = vunpack.c.l.bf16 %v916_v61 }
  0x1e   :  { %v945_v25 = vadd.f32 %v189_v60, %v146_v3  ;;  %v948_v28 = vadd.f32 %v193_v11, %v150_v8  ;;  %v951_v29 = vsub.s32 1, %v821_v17  ;;  %v422_v32 = vunpack.c.l.bf16 %v921_v4 }
  0x1f   :  { %v426_v33 = vunpack.c.l.bf16 %v926_v7  ;;  %v430_v43 = vunpack.c.l.bf16 %v934_v18  ;;  %v958_v45 = vsub.s32 2, %v821_v17  ;;  %v961_v46 = vsub.s32 3, %v821_v17 }
  0x20   :  { %v66_v47 = vunpack.c.h.bf16 %v775_v2  ;;  %v70_v51 = vunpack.c.h.bf16 %v784_v5  ;;  %v74_v52 = vunpack.c.h.bf16 %v789_v6  ;;  %v80_v53 = vmul.f32 %v878_v39, %v62_v10 }
  0x21   :  { %1470 = vst [vmem:[#allocation5_spill] sm:$0xff] %v961_v46  ;;  %v519_v54 = vrot.slane %v765_v0, %v961_v46  ;;  %v105_v57 = vunpack.c.h.bf16 %v796_v9  ;;  %v109_v58 = vunpack.c.h.bf16 %v806_v13  ;;  %v113_v59 = vunpack.c.h.bf16 %v811_v14 }
  0x22   :  { %v84_v60 = vmul.f32 %v878_v39, %v66_v47  ;;  %v88_v2 = vmul.f32 %v878_v39, %v70_v51  ;;  %v92_v5 = vmul.f32 %v878_v39, %v74_v52  ;;  %v117_v6 = vunpack.c.h.bf16 %v816_v15 }
  0x23   :  { %v979_v1 = vrot.slane %v519_v54, %v961_v46  ;;  %v123_v10 = vmul.f32 %v890_v48, %v105_v57  ;;  %v127_v62 = vmul.f32 %v890_v48, %v109_v58  ;;  %v131_v9 = vmul.f32 %v890_v48, %v113_v59 }
  0x24   :  { %v135_v13 = vmul.f32 %v890_v48, %v117_v6  ;;  %v164_v14 = vunpack.c.h.bf16 %v828_v22  ;;  %v168_v63 = vunpack.c.h.bf16 %v833_v23  ;;  %v172_v3 = vunpack.c.h.bf16 %v838_v24 }
  0x25   :  { %v139_v8 = vadd.f32 %v123_v10, %v80_v53  ;;  %v143_v11 = vadd.f32 %v127_v62, %v84_v60  ;;  %v147_v15 = vadd.f32 %v131_v9, %v88_v2  ;;  %v176_v47 = vunpack.c.h.bf16 %v844_v26 }
  0x26   :  { %v151_v51 = vadd.f32 %v135_v13, %v92_v5  ;;  %v182_v52 = vmul.f32 %v893_v49, %v164_v14  ;;  %v186_v54 = vmul.f32 %v893_v49, %v168_v63  ;;  %v190_v57 = vmul.f32 %v893_v49, %v172_v3 }
  0x27   :  { %v194_v58 = vmul.f32 %v893_v49, %v176_v47  ;;  %v223_v22 = vunpack.c.h.bf16 %v852_v30  ;;  %v227_v23 = vunpack.c.h.bf16 %v857_v31  ;;  %v231_v24 = vunpack.c.h.bf16 %v863_v34 }
  0x28   :  { %v713_v53 = vpop.eup %712  ;;  %v198_v59 = vadd.f32 %v182_v52, %v139_v8  ;;  %v202_v60 = vadd.f32 %v186_v54, %v143_v11  ;;  %v206_v2 = vadd.f32 %v190_v57, %v147_v15  ;;  %v235_v26 = vunpack.c.h.bf16 %v868_v35 }
  0x29   :  { %v238_v5 = vmul.f32 %v713_v53, %v765_v0  ;;  %v337_v6 = vrot.slane %v713_v53, 7  ;;  %v438_v10 = vrot.slane %v713_v53, 6  ;;  %v210_v62 = vadd.f32 %v194_v58, %v151_v51 }
  0x2a   :  { %v1463_v9 = vsub.s32 4, %v821_v17  ;;  %v320_v13 = vunpack.c.h.bf16 %v875_v38  ;;  %v324_v14 = vunpack.c.h.bf16 %v902_v55  ;;  %v328_v63 = vunpack.c.h.bf16 %v907_v56 }
  0x2b   :  { %v245_v3 = vrot.slane %v238_v5, %v883_v42  ;;  %v341_v8 = vmul.f32 %v337_v6, %v765_v0  ;;  %v442_v11 = vmul.f32 %v438_v10, %v765_v0  ;;  %v332_v15 = vunpack.c.h.bf16 %v916_v61 }
  0x2c   :  { %v249_v47 = vrot.slane %v238_v5, %v1463_v9  ;;  %v1464_v51 = vsub.s32 5, %v821_v17  ;;  %v1471_v38 = vunpack.c.l.bf16 %v939_v19 }
  0x2d   :  { %v265_v57 = vrot.slane %v245_v3, %v883_v42  ;;  %v348_v58 = vrot.slane %v341_v8, %v951_v29  ;;  %v449_v53 = vrot.slane %v442_v11, %v958_v45 }
  0x2e   :  { %v269_v10 = vrot.slane %v249_v47, %v883_v42  ;;  %v352_v44 = vrot.slane %v341_v8, %v1464_v51 }
  0x2f   :  { %v278_v54 = vmul.f32 %v265_v57, %v222_v36  ;;  %v282_v3 = vmul.f32 %v265_v57, %v226_v37  ;;  %v286_v52 = vmul.f32 %v265_v57, %v230_v40  ;;  %v290_v6 = vmul.f32 %v265_v57, %v234_v41 }
  0x30   :  { %v368_v47 = vrot.slane %v348_v58, %v951_v29  ;;  %v469_v8 = vrot.slane %v449_v53, %v958_v45  ;;  %v279_v51 = vmul.f32 %v269_v10, %v223_v22  ;;  %v283_v5 = vmul.f32 %v269_v10, %v227_v23 }
  0x31   :  { %v294_v9 = vadd.f32 %v278_v54, %v941_v20  ;;  %v298_v30 = vadd.f32 %v282_v3, %v943_v21  ;;  %v302_v36 = vadd.f32 %v286_v52, %v945_v25  ;;  %v306_v31 = vadd.f32 %v290_v6, %v948_v28  ;;  %v1096_v6 = vld [vmem:[%s1461_s2 + $0x38] sm:$0xff] }
  0x32   :  { %v381_v34 = vmul.f32 %v368_v47, %v319_v50  ;;  %v385_v35 = vmul.f32 %v368_v47, %v323_v12  ;;  %v389_v37 = vmul.f32 %v368_v47, %v327_v16  ;;  %v393_v40 = vmul.f32 %v368_v47, %v331_v27 }
  0x33   :  { %v482_v41 = vmul.f32 %v469_v8, %v422_v32  ;;  %v486_v20 = vmul.f32 %v469_v8, %v426_v33  ;;  %v490_v21 = vmul.f32 %v469_v8, %v430_v43  ;;  %v494_v50 = vmul.f32 %v469_v8, %v1471_v38 }
  0x34   :  { %v397_v55 = vadd.f32 %v381_v34, %v294_v9  ;;  %v401_v12 = vadd.f32 %v385_v35, %v298_v30  ;;  %v405_v25 = vadd.f32 %v389_v37, %v302_v36  ;;  %v409_v56 = vadd.f32 %v393_v40, %v306_v31 }
  0x35   :  { %v287_v16 = vmul.f32 %v269_v10, %v231_v24  ;;  %v291_v28 = vmul.f32 %v269_v10, %v235_v26  ;;  %v295_v61 = vadd.f32 %v279_v51, %v198_v59  ;;  %v299_v27 = vadd.f32 %v283_v5, %v202_v60 }
  0x36   :  { %v498_v22 = vadd.f32 %v482_v41, %v397_v55  ;;  %v502_v23 = vadd.f32 %v486_v20, %v401_v12  ;;  %v506_v32 = vadd.f32 %v490_v21, %v405_v25  ;;  %v510_v52 = vadd.f32 %v494_v50, %v409_v56 }
  0x37   :  { %v303_v54 = vadd.f32 %v287_v16, %v206_v2  ;;  %v307_v33 = vadd.f32 %v291_v28, %v210_v62  ;;  %v372_v57 = vrot.slane %v352_v44, %v951_v29  ;;  %v1472_v43 = vsub.s32 6, %v821_v17  ;;  %v1068_v44 = vld [vmem:[%s1460_s1 + $0x8] sm:$0xff] }
  0x38   :  { %v1054_v9 = vmul.f32 %v979_v1, %v498_v22  ;;  %v1057_v53 = vmul.f32 %v979_v1, %v502_v23  ;;  %v1060_v24 = vmul.f32 %v979_v1, %v506_v32  ;;  %v1063_v59 = vmul.f32 %v979_v1, %v510_v52 }
  0x39   :  { %v453_v58 = vrot.slane %v442_v11, %v1472_v43  ;;  %v382_v60 = vmul.f32 %v372_v57, %v320_v13  ;;  %v386_v2 = vmul.f32 %v372_v57, %v324_v14  ;;  %v390_v26 = vmul.f32 %v372_v57, %v328_v63  ;;  %v1073_v11 = vld [vmem:[%s1461_s2 + $0x8] sm:$0xff]  ;;  %v1086_v63 = vld [vmem:[%s1461_s2 + $0x18] sm:$0xff] }
  0x3a   :  { %1473 = vst [vmem:[#allocation6_spill] sm:$0xff] %v1063_v59  ;;  %v394_v62 = vmul.f32 %v372_v57, %v332_v15  ;;  %v568_v51 = vmul.f32 %v1054_v9, %v1054_v9  ;;  %v572_v1 = vmul.f32 %v1057_v53, %v1057_v53  ;;  %v576_v13 = vmul.f32 %v1060_v24, %v1060_v24  ;;  %v1091_v15 = vld [vmem:[%s1461_s2 + $0x28] sm:$0xff] }
  0x3b   :  { %v580_v14 = vmul.f32 %v1063_v59, %v1063_v59  ;;  %v398_v10 = vadd.f32 %v382_v60, %v295_v61  ;;  %v402_v5 = vadd.f32 %v386_v2, %v299_v27  ;;  %v406_v3 = vadd.f32 %v390_v26, %v303_v54 }
  0x3c   :  { %v410_v47 = vadd.f32 %v394_v62, %v307_v33  ;;  %v584_v8 = vadd.f32 %v572_v1, %v568_v51  ;;  %v473_v30 = vrot.slane %v453_v58, %v958_v45  ;;  %v1465_v36 = vsub.s32 7, %v821_v17  ;;  %v1143_v62 = vld [vmem:[%s1461_s2 + $0x68] sm:$0xff]  ;;  %v1148_v51 = vld [vmem:[%s1461_s2 + $0x78] sm:$0xff] }
  0x3d   :  { %v30_v31 = vmul.f32 %v1068_v44, %v1068_v44  ;;  %v63_v34 = vunpack.c.l.bf16 %v1073_v11  ;;  %v67_v35 = vunpack.c.l.bf16 %v1086_v63  ;;  %v71_v37 = vunpack.c.l.bf16 %v1091_v15 }
  0x3e   :  { %v75_v40 = vunpack.c.l.bf16 %v1096_v6  ;;  %v585_v41 = vadd.f32 %v584_v8, %v576_v13  ;;  %v1474_v20 = vunpack.c.h.bf16 %v921_v4  ;;  %v1475_v38 = vunpack.c.h.bf16 %v926_v7 }
  0x3f   :  { %v1476_v55 = vunpack.c.h.bf16 %v934_v18  ;;  %v1477_v25 = vunpack.c.h.bf16 %v939_v19  ;;  %v523_v16 = vrot.slane %v765_v0, %v1465_v36  ;;  %v666_v28 = vrot.slane %v30_v31, 9  ;;  %v1122_v19 = vld [vmem:[%s1461_s2 + $0x48] sm:$0xff]  ;;  %v1127_v0 = vld [vmem:[%s1461_s2 + $0x58] sm:$0xff] }
  0x40   :  { %v483_v21 = vmul.f32 %v473_v30, %v1474_v20  ;;  %v487_v50 = vmul.f32 %v473_v30, %v1475_v38  ;;  %v668_v61 = vrot.slane %v30_v31, 10  ;;  %v586_v27 = vadd.f32 %v585_v41, %v580_v14  ;;  %v1177_v38 = vld [vmem:[%s1461_s2 + $0xa8] sm:$0xff] }
  0x41   :  { %v491_v12 = vmul.f32 %v473_v30, %v1476_v55  ;;  %v495_v56 = vmul.f32 %v473_v30, %v1477_v25  ;;  %v543_v7 = vrot.slane %v523_v16, %v961_v46  ;;  %v40_v52 = vadd.f32 %v666_v28, %v30_v31 }
  0x42   :  { %v499_v22 = vadd.f32 %v483_v21, %v398_v10  ;;  %v503_v23 = vadd.f32 %v487_v50, %v402_v5  ;;  %v81_v18 = vmul.f32 %v878_v39, %v63_v34  ;;  %v587_v54 = vrot.slane %v586_v27, 4  ;;  %v1155_v5 = vld [vmem:[%s1461_s2 + $0x88] sm:$0xff] }
  0x43   :  { %v507_v4 = vadd.f32 %v491_v12, %v406_v3  ;;  %v511_v32 = vadd.f32 %v495_v56, %v410_v47  ;;  %v85_v33 = vmul.f32 %v878_v39, %v67_v35  ;;  %v89_v57 = vmul.f32 %v878_v39, %v71_v37  ;;  %v1185_v56 = vld [vmem:[%s1461_s2 + $0xb8] sm:$0xff] }
  0x44   :  { %v93_v43 = vmul.f32 %v878_v39, %v75_v40  ;;  %v1132_v58 = vmul.f32 %v543_v7, %v499_v22  ;;  %v1134_v60 = vmul.f32 %v543_v7, %v503_v23  ;;  %v588_v1 = vadd.f32 %v587_v54, %v586_v27  ;;  %v1170_v40 = vld [vmem:[%s1461_s2 + $0x98] sm:$0xff]  ;;  %v1191_v22 = vld [vmem:[%s1461_s2 + $0xc8] sm:$0xff] }
  0x45   :  { %v1136_v2 = vmul.f32 %v543_v7, %v507_v4  ;;  %v1138_v26 = vmul.f32 %v543_v7, %v511_v32  ;;  %v48_v13 = vadd.f32 %v668_v61, %v40_v52  ;;  %v106_v14 = vunpack.c.l.bf16 %v1122_v19  ;;  %v1196_v23 = vld [vmem:[%s1461_s2 + $0xd8] sm:$0xff] }
  0x46   :  { %v110_v10 = vunpack.c.l.bf16 %v1127_v0  ;;  %v569_v3 = vmul.f32 %v1132_v58, %v1132_v58  ;;  %v573_v47 = vmul.f32 %v1134_v60, %v1134_v60  ;;  %v589_v31 = vrot.slane %v588_v1, 2 }
  0x47   :  { %1478 = vst [vmem:[#allocation7_spill] sm:$0xff] %v1136_v2  ;;  %1479 = vst [vmem:[#allocation8_spill] sm:$0xff] %v1138_v26  ;;  %v577_v8 = vmul.f32 %v1136_v2, %v1136_v2  ;;  %v581_v30 = vmul.f32 %v1138_v26, %v1138_v26  ;;  %v50_v34 = vmax.f32 %v48_v13, 1e-24  ;;  %v114_v35 = vunpack.c.l.bf16 %v1143_v62  ;;  %v1205_v13 = vld [vmem:[%s1461_s2 + $0xe8] sm:$0xff] }
  0x48   :  { %v118_v37 = vunpack.c.l.bf16 %v1148_v51  ;;  %v593_v41 = vadd.f32 %v573_v47, %v569_v3  ;;  %v124_v20 = vmul.f32 %v890_v48, %v106_v14  ;;  %v128_v21 = vmul.f32 %v890_v48, %v110_v10  ;;  %v1210_v14 = vld [vmem:[%s1461_s2 + $0xf8] sm:$0xff]  ;;  %v1218_v47 = vld [vmem:[%s1461_s2 + $0x108] sm:$0xff] }
  0x49   :  { %v165_v50 = vunpack.c.l.bf16 %v1155_v5  ;;  %v590_v55 = vadd.f32 %v589_v31, %v588_v1  ;;  %714 = vrsqrt.f32 %v50_v34  ;;  %v132_v12 = vmul.f32 %v890_v48, %v114_v35 }
  0x4a   :  { %v136_v25 = vmul.f32 %v890_v48, %v118_v37  ;;  %v594_v16 = vadd.f32 %v593_v41, %v577_v8  ;;  %v140_v28 = vadd.f32 %v124_v20, %v81_v18  ;;  %v144_v61 = vadd.f32 %v128_v21, %v85_v33  ;;  %v1223_v8 = vld [vmem:[%s1461_s2 + $0x118] sm:$0xff]  ;;  %v1233_v37 = vld [vmem:[%s1461_s2 + $0x128] sm:$0xff] }
  0x4b   :  { %v169_v27 = vunpack.c.l.bf16 %v1170_v40  ;;  %v591_v4 = vrot.slane %v590_v55, 1  ;;  %v148_v32 = vadd.f32 %v132_v12, %v89_v57  ;;  %v173_v52 = vunpack.c.l.bf16 %v1177_v38  ;;  %v1238_v41 = vld [vmem:[%s1461_s2 + $0x138] sm:$0xff]  ;;  %v1243_v20 = vld [vmem:[%s1461_s2 + $0x148] sm:$0xff] }
  0x4c   :  { %v152_v7 = vadd.f32 %v136_v25, %v93_v43  ;;  %v595_v54 = vadd.f32 %v594_v16, %v581_v30  ;;  %v177_v18 = vunpack.c.l.bf16 %v1185_v56  ;;  %v183_v33 = vmul.f32 %v893_v49, %v165_v50  ;;  %v1252_v25 = vld [vmem:[%s1461_s2 + $0x158] sm:$0xff]  ;;  %v1257_v16 = vld [vmem:[%s1461_s2 + $0x168] sm:$0xff] }
  0x4d   :  { %v187_v1 = vmul.f32 %v893_v49, %v169_v27  ;;  %v592_v57 = vadd.f32 %v591_v4, %v590_v55  ;;  %v191_v43 = vmul.f32 %v893_v49, %v173_v52  ;;  %v224_v10 = vunpack.c.l.bf16 %v1191_v22 }
  0x4e   :  { %v596_v30 = vrot.slane %v595_v54, 4  ;;  %v195_v31 = vmul.f32 %v893_v49, %v177_v18  ;;  %v1226_v34 = vadd.f32 %v183_v33, %v140_v28  ;;  %v232_v55 = vunpack.c.l.bf16 %v1205_v13  ;;  %v1262_v28 = vld [vmem:[%s1461_s2 + $0x178] sm:$0xff] }
  0x4f   :  { %v1228_v35 = vadd.f32 %v187_v1, %v144_v61  ;;  %v620_v21 = vmax.f32 %v592_v57, 1e-24  ;;  %v1245_v50 = vadd.f32 %v191_v43, %v148_v32  ;;  %v236_v12 = vunpack.c.l.bf16 %v1210_v14 }
  0x50   :  { %v597_v61 = vadd.f32 %v596_v30, %v595_v54  ;;  %v1264_v27 = vadd.f32 %v195_v31, %v152_v7  ;;  %v527_v7 = vrot.slane %v1068_v44, %v961_v46  ;;  %v64_v30 = vunpack.c.h.bf16 %v1073_v11 }
  0x51   :  { %716 = vrsqrt.f32 %v620_v21  ;;  %v68_v31 = vunpack.c.h.bf16 %v1086_v63  ;;  %v72_v21 = vunpack.c.h.bf16 %v1091_v15  ;;  %v76_v18 = vunpack.c.h.bf16 %v1096_v6 }
  0x52   :  { %v598_v1 = vrot.slane %v597_v61, 2  ;;  %v107_v33 = vunpack.c.h.bf16 %v1122_v19  ;;  %v111_v57 = vunpack.c.h.bf16 %v1127_v0  ;;  %v1283_v43 = vrot.slane %v527_v7, %v961_v46 }
  0x53   :  { %v82_v54 = vmul.f32 %v878_v39, %v64_v30  ;;  %v86_v52 = vmul.f32 %v878_v39, %v68_v31  ;;  %v90_v11 = vmul.f32 %v878_v39, %v72_v21  ;;  %v94_v15 = vmul.f32 %v878_v39, %v76_v18 }
  0x54   :  { %v599_v36 = vadd.f32 %v598_v1, %v597_v61  ;;  %v115_v61 = vunpack.c.h.bf16 %v1143_v62  ;;  %v119_v6 = vunpack.c.h.bf16 %v1148_v51  ;;  %v125_v7 = vmul.f32 %v890_v48, %v107_v33 }
  0x55   :  { %v129_v31 = vmul.f32 %v890_v48, %v111_v57 }
  0x56   :  { %v715_v32 = vpop.eup %714  ;;  %v600_v63 = vrot.slane %v599_v36, 1  ;;  %v133_v21 = vmul.f32 %v890_v48, %v115_v61  ;;  %v137_v4 = vmul.f32 %v890_v48, %v119_v6  ;;  %v141_v18 = vadd.f32 %v125_v7, %v82_v54 }
  0x57   :  { %v1292_v19 = vmul.f32 %v715_v32, %v1068_v44  ;;  %v338_v0 = vrot.slane %v715_v32, 7  ;;  %v439_v1 = vrot.slane %v715_v32, 6  ;;  %v145_v3 = vadd.f32 %v129_v31, %v86_v52 }
  0x58   :  { %v601_v30 = vadd.f32 %v600_v63, %v599_v36  ;;  %v149_v33 = vadd.f32 %v133_v21, %v90_v11  ;;  %v153_v36 = vadd.f32 %v137_v4, %v94_v15  ;;  %v166_v61 = vunpack.c.h.bf16 %v1155_v5 }
  0x59   :  { %v253_v39 = vrot.slane %v1292_v19, %v883_v42  ;;  %v1301_v62 = vmul.f32 %v338_v0, %v1068_v44  ;;  %v1304_v51 = vmul.f32 %v439_v1, %v1068_v44  ;;  %v170_v6 = vunpack.c.h.bf16 %v1170_v40 }
  0x5a   :  { %v621_v32 = vmax.f32 %v601_v30, 1e-24  ;;  %v174_v0 = vunpack.c.h.bf16 %v1177_v38  ;;  %v178_v54 = vunpack.c.h.bf16 %v1185_v56  ;;  %v1480_v52 = vunpack.c.l.bf16 %v1196_v23 }
  0x5b   :  { %v273_v57 = vrot.slane %v253_v39, %v883_v42  ;;  %v356_v63 = vrot.slane %v1301_v62, %v951_v29  ;;  %v457_v48 = vrot.slane %v1304_v51, %v958_v45  ;;  %v184_v40 = vmul.f32 %v893_v49, %v166_v61 }
  0x5c   :  { %718 = vrsqrt.f32 %v621_v32  ;;  %v188_v38 = vmul.f32 %v893_v49, %v170_v6  ;;  %v1481_v21 = vunpack.c.l.bf16 %v1218_v47  ;;  %v1482_v32 = vunpack.c.l.bf16 %v1223_v8 }
  0x5d   :  { %v280_v4 = vmul.f32 %v273_v57, %v224_v10  ;;  %v284_v11 = vmul.f32 %v273_v57, %v1480_v52  ;;  %v288_v15 = vmul.f32 %v273_v57, %v232_v55  ;;  %v292_v1 = vmul.f32 %v273_v57, %v236_v12 }
  0x5e   :  { %v1319_v7 = vpop.eup %716  ;;  %v376_v30 = vrot.slane %v356_v63, %v951_v29  ;;  %v477_v5 = vrot.slane %v457_v48, %v958_v45  ;;  %v1483_v63 = vunpack.c.l.bf16 %v1233_v37  ;;  %v1487_v6 = vunpack.c.l.bf16 %v1257_v16 }
  0x5f   :  { %v628_v56 = vmul.f32 %v1319_v7, %v1054_v9  ;;  %v296_v10 = vadd.f32 %v280_v4, %v1226_v34  ;;  %v300_v31 = vadd.f32 %v284_v11, %v1228_v35  ;;  %v304_v55 = vadd.f32 %v288_v15, %v1245_v50 }
  0x60   :  { %v308_v12 = vadd.f32 %v292_v1, %v1264_v27  ;;  %v383_v39 = vmul.f32 %v376_v30, %v1481_v21  ;;  %v387_v57 = vmul.f32 %v376_v30, %v1482_v32  ;;  %v391_v48 = vmul.f32 %v376_v30, %v1483_v63 }
  0x61   :  { %644 = vst [vmem:[%s1462_s3] sm:$0xff] %v628_v56  ;;  %v1484_v9 = vunpack.c.l.bf16 %v1238_v41  ;;  %v1485_v35 = vunpack.c.l.bf16 %v1243_v20  ;;  %v1486_v27 = vunpack.c.l.bf16 %v1252_v25  ;;  %v492_v4 = vmul.f32 %v477_v5, %v1487_v6 }
  0x62   :  { %v399_v52 = vadd.f32 %v383_v39, %v296_v10  ;;  %v403_v11 = vadd.f32 %v387_v57, %v300_v31  ;;  %v407_v15 = vadd.f32 %v391_v48, %v304_v55  ;;  %v1488_v1 = vunpack.c.l.bf16 %v1262_v28 }
  0x63   :  { %v395_v34 = vmul.f32 %v376_v30, %v1484_v9  ;;  %v484_v50 = vmul.f32 %v477_v5, %v1485_v35  ;;  %v488_v61 = vmul.f32 %v477_v5, %v1486_v27  ;;  %v192_v56 = vmul.f32 %v893_v49, %v174_v0 }
  0x64   :  { %v496_v21 = vmul.f32 %v477_v5, %v1488_v1  ;;  %v196_v30 = vmul.f32 %v893_v49, %v178_v54  ;;  %v200_v63 = vadd.f32 %v184_v40, %v141_v18  ;;  %v508_v26 = vadd.f32 %v492_v4, %v407_v15 }
  0x65   :  { %v411_v32 = vadd.f32 %v395_v34, %v308_v12  ;;  %v500_v9 = vadd.f32 %v484_v50, %v399_v52  ;;  %v504_v35 = vadd.f32 %v488_v61, %v403_v11  ;;  %v204_v59 = vadd.f32 %v188_v38, %v145_v3 }
  0x66   :  { %v208_v46 = vadd.f32 %v192_v56, %v149_v33  ;;  %v212_v2 = vadd.f32 %v196_v30, %v153_v36  ;;  %v225_v10 = vunpack.c.h.bf16 %v1191_v22  ;;  %v1360_v0 = vmul.f32 %v1283_v43, %v508_v26 }
  0x67   :  { %v512_v27 = vadd.f32 %v496_v21, %v411_v32  ;;  %v1354_v31 = vmul.f32 %v1283_v43, %v500_v9  ;;  %v1357_v5 = vmul.f32 %v1283_v43, %v504_v35  ;;  %v229_v49 = vunpack.c.h.bf16 %v1196_v23 }
  0x68   :  { %v233_v3 = vunpack.c.h.bf16 %v1205_v13  ;;  %v237_v33 = vunpack.c.h.bf16 %v1210_v14  ;;  %v1489_v22 = vsub.s32 4, %v821_v17  ;;  %v578_v23 = vmul.f32 %v1360_v0, %v1360_v0 }
  0x69   :  { %v1364_v18 = vmul.f32 %v1283_v43, %v512_v27  ;;  %v570_v54 = vmul.f32 %v1354_v31, %v1354_v31  ;;  %v574_v26 = vmul.f32 %v1357_v5, %v1357_v5  ;;  %v322_v43 = vunpack.c.h.bf16 %v1218_v47  ;;  %v719_v40 = vpop.eup %718 }
  0x6a   :  { %v257_v36 = vrot.slane %v1292_v19, %v1489_v22  ;;  %v326_v38 = vunpack.c.h.bf16 %v1223_v8  ;;  %v330_v19 = vunpack.c.h.bf16 %v1233_v37  ;;  %v629_v55 = vmul.f32 %v719_v40, %v1132_v58 }
  0x6b   :  { %v582_v13 = vmul.f32 %v1364_v18, %v1364_v18  ;;  %v602_v12 = vadd.f32 %v574_v26, %v570_v54  ;;  %v334_v39 = vunpack.c.h.bf16 %v1238_v41  ;;  %v1490_v57 = vsub.s32 5, %v821_v17 }
  0x6c   :  { %v277_v14 = vrot.slane %v257_v36, %v883_v42  ;;  %645 = vst [vmem:[%s1462_s3 + $0x8] sm:$0xff] %v629_v55  ;;  %v425_v58 = vunpack.c.h.bf16 %v1243_v20  ;;  %v429_v37 = vunpack.c.h.bf16 %v1252_v25  ;;  %v433_v32 = vunpack.c.h.bf16 %v1257_v16 }
  0x6d   :  { %v360_v48 = vrot.slane %v1301_v62, %v1490_v57  ;;  %v603_v42 = vadd.f32 %v602_v12, %v578_v23  ;;  %v437_v56 = vunpack.c.h.bf16 %v1262_v28  ;;  %v1491_v30 = vsub.s32 6, %v821_v17 }
  0x6e   :  { %v281_v47 = vmul.f32 %v277_v14, %v225_v10  ;;  %v285_v34 = vmul.f32 %v277_v14, %v229_v49  ;;  %v289_v50 = vmul.f32 %v277_v14, %v233_v3  ;;  %v293_v61 = vmul.f32 %v277_v14, %v237_v33  ;;  %v1493_v10 = vld [vmem:[#allocation7_spill] sm:$0xff] }
  0x6f   :  { %v380_v8 = vrot.slane %v360_v48, %v951_v29  ;;  %v604_v62 = vadd.f32 %v603_v42, %v582_v13  ;;  %v461_v29 = vrot.slane %v1304_v51, %v1491_v30  ;;  %v632_v16 = vmul.f32 %v1319_v7, %v1057_v53  ;;  %v1495_v53 = vld [vmem:[#allocation6_spill] sm:$0xff] }
  0x70   :  { %v297_v41 = vadd.f32 %v281_v47, %v200_v63  ;;  %v301_v6 = vadd.f32 %v285_v34, %v204_v59  ;;  %v305_v4 = vadd.f32 %v289_v50, %v208_v46  ;;  %v309_v52 = vadd.f32 %v293_v61, %v212_v2 }
  0x71   :  { %v384_v11 = vmul.f32 %v380_v8, %v322_v43  ;;  %v388_v15 = vmul.f32 %v380_v8, %v326_v38  ;;  %v392_v1 = vmul.f32 %v380_v8, %v330_v19  ;;  %v396_v21 = vmul.f32 %v380_v8, %v334_v39  ;;  %648 = vst [vmem:[%s1462_s3 + $0x20] sm:$0xff] %v632_v16 }
  0x72   :  { %v605_v20 = vrot.slane %v604_v62, 4  ;;  %v481_v46 = vrot.slane %v461_v29, %v958_v45  ;;  %v1492_v2 = vsub.s32 7, %v821_v17  ;;  %v633_v28 = vmul.f32 %v719_v40, %v1134_v60  ;;  %v1494_v45 = vld [vmem:[#allocation5_spill] sm:$0xff]  ;;  %v1496_v60 = vld [vmem:[#allocation8_spill] sm:$0xff] }
  0x73   :  { %v400_v9 = vadd.f32 %v384_v11, %v297_v41  ;;  %v404_v25 = vadd.f32 %v388_v15, %v301_v6  ;;  %v408_v63 = vadd.f32 %v392_v1, %v305_v4  ;;  %v412_v59 = vadd.f32 %v396_v21, %v309_v52 }
  0x74   :  { %v531_v35 = vrot.slane %v1068_v44, %v1492_v2  ;;  %v606_v27 = vadd.f32 %v605_v20, %v604_v62  ;;  %v636_v51 = vmul.f32 %v1319_v7, %v1060_v24  ;;  %v637_v49 = vmul.f32 %v719_v40, %v1493_v10  ;;  %649 = vst [vmem:[%s1462_s3 + $0x28] sm:$0xff] %v633_v28 }
  0x75   :  { %v485_v3 = vmul.f32 %v481_v46, %v425_v58  ;;  %v489_v33 = vmul.f32 %v481_v46, %v429_v37  ;;  %v493_v22 = vmul.f32 %v481_v46, %v433_v32  ;;  %v497_v36 = vmul.f32 %v481_v46, %v437_v56 }
  0x76   :  { %v607_v17 = vrot.slane %v606_v27, 2  ;;  %v551_v44 = vrot.slane %v531_v35, %v1494_v45  ;;  %652 = vst [vmem:[%s1462_s3 + $0x40] sm:$0xff] %v636_v51  ;;  %653 = vst [vmem:[%s1462_s3 + $0x48] sm:$0xff] %v637_v49  ;;  %v640_v24 = vmul.f32 %v1319_v7, %v1495_v53  ;;  %v641_v54 = vmul.f32 %v719_v40, %v1496_v60 }
  0x77   :  { %v501_v26 = vadd.f32 %v485_v3, %v400_v9  ;;  %v505_v23 = vadd.f32 %v489_v33, %v404_v25  ;;  %v509_v43 = vadd.f32 %v493_v22, %v408_v63  ;;  %v513_v13 = vadd.f32 %v497_v36, %v412_v59 }
  0x78   :  { %v608_v14 = vadd.f32 %v607_v17, %v606_v27  ;;  %656 = vst [vmem:[%s1462_s3 + $0x60] sm:$0xff] %v640_v24  ;;  %657 = vst [vmem:[%s1462_s3 + $0x68] sm:$0xff] %v641_v54 }
  0x79   :  { %v555_v38 = vmul.f32 %v551_v44, %v501_v26  ;;  %v559_v19 = vmul.f32 %v551_v44, %v505_v23  ;;  %v563_v55 = vmul.f32 %v551_v44, %v509_v43  ;;  %v567_v12 = vmul.f32 %v551_v44, %v513_v13 }
  0x7a   :  { %v609_v7 = vrot.slane %v608_v14, 1 }
  0x7b   :  { %v571_v39 = vmul.f32 %v555_v38, %v555_v38  ;;  %v575_v40 = vmul.f32 %v559_v19, %v559_v19  ;;  %v579_v57 = vmul.f32 %v563_v55, %v563_v55  ;;  %v583_v47 = vmul.f32 %v567_v12, %v567_v12 }
  0x7c   :  { %v610_v48 = vadd.f32 %v609_v7, %v608_v14 }
  0x7d   :  { %v611_v34 = vadd.f32 %v575_v40, %v571_v39 }
  0x7e   :  { %v622_v50 = vmax.f32 %v610_v48, 1e-24 }
  0x7f   :  { %v612_v61 = vadd.f32 %v611_v34, %v579_v57 }
  0x80   :  { %720 = vrsqrt.f32 %v622_v50 }
  0x81   :  { %v613_v42 = vadd.f32 %v612_v61, %v583_v47 }
  0x83   :  { %v614_v8 = vrot.slane %v613_v42, 4 }
  0x85   :  { %v615_v58 = vadd.f32 %v614_v8, %v613_v42 }
  0x87   :  { %v616_v37 = vrot.slane %v615_v58, 2 }
  0x89   :  { %v617_v41 = vadd.f32 %v616_v37, %v615_v58 }
  0x8b   :  { %v618_v6 = vrot.slane %v617_v41, 1 }
  0x8d   :  { %v721_v4 = vpop.eup %720  ;;  %v619_v52 = vadd.f32 %v618_v6, %v617_v41 }
  0x8e   :  { %v630_v62 = vmul.f32 %v721_v4, %v1354_v31  ;;  %v634_v11 = vmul.f32 %v721_v4, %v1357_v5  ;;  %v638_v15 = vmul.f32 %v721_v4, %v1360_v0  ;;  %v642_v1 = vmul.f32 %v721_v4, %v1364_v18 }
  0x8f   :  { %v623_v21 = vmax.f32 %v619_v52, 1e-24 }
  0x90   :  { %646 = vst [vmem:[%s1462_s3 + $0x10] sm:$0xff] %v630_v62  ;;  %650 = vst [vmem:[%s1462_s3 + $0x30] sm:$0xff] %v634_v11 }
  0x91   :  { %654 = vst [vmem:[%s1462_s3 + $0x50] sm:$0xff] %v638_v15  ;;  %658 = vst [vmem:[%s1462_s3 + $0x70] sm:$0xff] %v642_v1  ;;  %722 = vrsqrt.f32 %v623_v21 }
  0x9e   :  { %v723_v31 = vpop.eup %722 }
  0x9f   :  { %v631_v5 = vmul.f32 %v723_v31, %v555_v38  ;;  %v635_v0 = vmul.f32 %v723_v31, %v559_v19  ;;  %v639_v18 = vmul.f32 %v723_v31, %v563_v55  ;;  %v643_v32 = vmul.f32 %v723_v31, %v567_v12 }
  0xa1   :  { %647 = vst [vmem:[%s1462_s3 + $0x18] sm:$0xff] %v631_v5  ;;  %651 = vst [vmem:[%s1462_s3 + $0x38] sm:$0xff] %v635_v0 }
  0xa2   :  { %655 = vst [vmem:[%s1462_s3 + $0x58] sm:$0xff] %v639_v18  ;;  %659 = vst [vmem:[%s1462_s3 + $0x78] sm:$0xff] %v643_v32 }
  0xa3   :  { %664 = vsyncpa [#allocation3], 1 }

</bundles_post_ra>
